<compile_context>
chip_gen: v7x
topology: tpu7x:2x2x1
jax: 0.10.0
libtpu: 0.0.40
codegen_flags: <defaults>
</compile_context>

<pallas_src>
import jax
import jax.numpy as jnp
from jax.experimental import pallas as pl
from jax.experimental.pallas import tpu as pltpu


def _chain_mm_kernel(x1_ref, x2_ref, o_ref):
    n = x1_ref.shape[0]
    x1 = x1_ref[...]
    x2 = x2_ref[...]

    # Level 1 (fused): [v1; v2] = [x1; x2] @ x2   -> (2N, N)
    lvl1 = jnp.dot(
        jnp.concatenate([x1, x2], axis=0), x2,
        preferred_element_type=jnp.float32,
    )
    v1 = lvl1[:n, :]
    v2 = lvl1[n:, :]

    # Level 2 (fused): [v4 | v3] = v1 @ [v1 | v2] -> (N, 2N)
    # (identical accumulation order to separate v1@v1 and v1@v2)
    lvl2 = jnp.dot(
        v1, jnp.concatenate([v1, v2], axis=1),
        preferred_element_type=jnp.float32,
    )
    v4 = lvl2[:, :n]
    v3 = lvl2[:, n:]

    # Level 3: v5 = v3 @ v2 (reference association: (v1 @ v2) @ v2)
    v5 = jnp.dot(v3, v2, preferred_element_type=jnp.float32)

    # torch.cat([v5, v4], dim=1) -> (N, 2N); single full-tile store.
    o_ref[...] = jnp.concatenate([v5, v4], axis=1).astype(o_ref.dtype)


def model_forward(x1: jax.Array, x2: jax.Array) -> jax.Array:
    assert x1.ndim == 2 and x2.ndim == 2
    n = x1.shape[0]
    assert x1.shape == (n, n) and x2.shape == (n, n), (
        "mm(x2, x2) / mm(v1, v1) require square inputs of matching size"
    )

    return pl.pallas_call(
        _chain_mm_kernel,
        out_shape=jax.ShapeDtypeStruct((n, 2 * n), jnp.float32),
        # Whole arrays resident in VMEM; no grid, no blocking.
        in_specs=[
            pl.BlockSpec(memory_space=pltpu.MemorySpace.VMEM),
            pl.BlockSpec(memory_space=pltpu.MemorySpace.VMEM),
        ],
        out_specs=pl.BlockSpec(memory_space=pltpu.MemorySpace.VMEM),
    )(x1, x2)


def _reference(x1, x2):
    v1 = x1 @ x2
    v2 = x2 @ x2
    v3 = v1 @ v2
    v4 = v1 @ v1
    v5 = v3 @ v2
    return jnp.concatenate([v5, v4], axis=1)


if __name__ == "__main__":
    N = 32
    key = jax.random.PRNGKey(0)
    k1, k2 = jax.random.split(key)
    x1 = jax.random.normal(k1, (N, N), dtype=jnp.float32)
    x2 = jax.random.normal(k2, (N, N), dtype=jnp.float32)

    out = model_forward(x1, x2)
    out = jax.block_until_ready(out)

    ref = _reference(x1, x2)
    assert out.shape == (N, 2 * N)
    assert jnp.allclose(out, ref, rtol=1e-4, atol=1e-4), "mismatch vs reference"

    print("KERNEL_OK")
</pallas_src>

<mosaic_0001>
module attributes {stable_mosaic.version = 11 : i64} {
  func.func @_chain_mm_kernel(%arg0: memref<32x32xf32, #tpu.memory_space<vmem>>, %arg1: memref<32x32xf32, #tpu.memory_space<vmem>>, %arg2: memref<32x64xf32, #tpu.memory_space<vmem>>) attributes {dimension_semantics = [], scalar_prefetch = 0 : i64, scratch_operands = 0 : i64, tpu.core_type = #tpu.core_type<tc>} {
    %c0 = arith.constant 0 : index
    %c0_0 = arith.constant 0 : index
    %0 = vector.load %arg0[%c0, %c0_0] : memref<32x32xf32, #tpu.memory_space<vmem>>, vector<32x32xf32>
    %c0_1 = arith.constant 0 : index
    %c0_2 = arith.constant 0 : index
    %1 = vector.load %arg1[%c0_1, %c0_2] : memref<32x32xf32, #tpu.memory_space<vmem>>, vector<32x32xf32>
    %2 = tpu.concatenate %0, %1 in 0 : vector<32x32xf32>, vector<32x32xf32> -> vector<64x32xf32>
    %cst = arith.constant dense<0.000000e+00> : vector<64x32xf32>
    %3 = tpu.matmul %2, %1, %cst {dimension_numbers = #tpu.dot_dimension_numbers<[1], [0], [0], [1], [0, 0, 1, 1], [], []>} : vector<64x32xf32>, vector<32x32xf32>, vector<64x32xf32> -> vector<64x32xf32>
    %4 = vector.extract_strided_slice %3 {offsets = [0, 0], sizes = [32, 32], strides = [1, 1]} : vector<64x32xf32> to vector<32x32xf32>
    %5 = vector.extract_strided_slice %3 {offsets = [32, 0], sizes = [32, 32], strides = [1, 1]} : vector<64x32xf32> to vector<32x32xf32>
    %6 = tpu.concatenate %4, %5 in 1 : vector<32x32xf32>, vector<32x32xf32> -> vector<32x64xf32>
    %cst_3 = arith.constant dense<0.000000e+00> : vector<32x64xf32>
    %7 = tpu.matmul %4, %6, %cst_3 {dimension_numbers = #tpu.dot_dimension_numbers<[1], [0], [0], [1], [0, 0, 1, 1], [], []>} : vector<32x32xf32>, vector<32x64xf32>, vector<32x64xf32> -> vector<32x64xf32>
    %8 = vector.extract_strided_slice %7 {offsets = [0, 0], sizes = [32, 32], strides = [1, 1]} : vector<32x64xf32> to vector<32x32xf32>
    %9 = vector.extract_strided_slice %7 {offsets = [0, 32], sizes = [32, 32], strides = [1, 1]} : vector<32x64xf32> to vector<32x32xf32>
    %cst_4 = arith.constant dense<0.000000e+00> : vector<32x32xf32>
    %10 = tpu.matmul %9, %5, %cst_4 {dimension_numbers = #tpu.dot_dimension_numbers<[1], [0], [0], [1], [0, 0, 1, 1], [], []>} : vector<32x32xf32>, vector<32x32xf32>, vector<32x32xf32> -> vector<32x32xf32>
    %11 = tpu.concatenate %10, %8 in 1 : vector<32x32xf32>, vector<32x32xf32> -> vector<32x64xf32>
    %c0_5 = arith.constant 0 : index
    %c0_6 = arith.constant 0 : index
    %12 = vector.load %arg2[%c0_5, %c0_6] : memref<32x64xf32, #tpu.memory_space<vmem>>, vector<32x64xf32>
    tpu.vector_store %arg2[%c0_5, %c0_6], %11 {strides = array<i32>} : memref<32x64xf32, #tpu.memory_space<vmem>>, vector<32x64xf32>,
    return
  }
}

</mosaic_0001>

<bundles_post_ra>
// kernel: tpu_custom_call.1
= control target key start
LH: loop header
LB: loop body
LE: loop exit
PB: predicated region body
PF: predicated region fallthrough
CT: control target
= control target key end

     0   :  { %7 = vsyncpa [#allocation3], 0  ;;  %s745_s0 = inlined_call_operand.hbm [shape: f32[32,32], index: 0, kind: input, shape index: {}]   ;;  %s746_s1 = inlined_call_operand.hbm [shape: f32[32,32], index: 1, kind: input, shape index: {}]   ;;  %s747_s2 = inlined_call_operand.hbm [shape: f32[32,64], index: 2, kind: output, shape index: {}]  }
   0x1   :  { %8 = vsyncpa [#allocation6], 0 }
   0x2   :  { %9 = vsyncpa [#allocation4], 0  ;;  %s644_s9 = smov [#allocation2]   ;;  %s572_s13 = scalar_lea.hbm %s745_s0, 512 }
   0x3   :  { %s15_s10 = sshll.u32 %s644_s9, 4  ;;  %p573_p0 = scmp.ne.s32.totalorder %s745_s0, %s572_s13  ;;  %s16_s10 = int_to_ptr.vmem [resolvable:$true] %s15_s10 }
   0x4   :  { %p576_p1 = scmp.lt.u32.totalorder %s572_s13, %s745_s0 }
   0x6   :  { %p578_p2 = pnand %p576_p1, %p573_p0 }
   0x8   :  { %581 = shalt.err (!%p578_p2)
}
   0x9   :  { %s582_s18 = scalar_lea.vmem %s16_s10, 512  ;;  %p587_p4 = scmp.lt.s32.totalorder %s16_s10, %s16_s10 }
   0xa   :  { %p583_p3 = scmp.ne.s32.totalorder %s16_s10, %s582_s18  ;;  %p588_p5 = scmp.lt.s32.totalorder %s582_s18, %s582_s18 }
   0xc   :  { %p589_p6 = por %p588_p5, %p587_p4 }
   0xe   :  { %p590_p7 = pnand %p589_p6, %p583_p3 }
  0x10   :  { %593 = shalt.err (!%p590_p7)
}
  0x11   :  { %s645_s19 = smov 128   ;;  %s646_s20 = smov 8  }
  0x12   :  { %21 = dma.hbm_to_vmem [thread:$0]  %s745_s0, 512, %s16_s10, [#allocation3], %s645_s19, %s645_s19, %s646_s20  }
  0x13   :  { %s647_s23 = smov [#allocation5]   ;;  %s594_s27 = scalar_lea.hbm %s746_s1, 512 }
  0x14   :  { %s27_s24 = sshll.u32 %s647_s23, 4  ;;  %p595_p8 = scmp.ne.s32.totalorder %s746_s1, %s594_s27  ;;  %s28_s24 = int_to_ptr.vmem [resolvable:$true] %s27_s24 }
  0x15   :  { %p598_p9 = scmp.lt.u32.totalorder %s594_s27, %s746_s1 }
  0x17   :  { %p600_p10 = pnand %p598_p9, %p595_p8 }
  0x19   :  { %603 = shalt.err (!%p600_p10)
}
  0x1a   :  { %s604_s4 = scalar_lea.vmem %s28_s24, 512  ;;  %p609_p12 = scmp.lt.s32.totalorder %s28_s24, %s28_s24 }
  0x1b   :  { %p605_p11 = scmp.ne.s32.totalorder %s28_s24, %s604_s4  ;;  %p610_p13 = scmp.lt.s32.totalorder %s604_s4, %s604_s4 }
  0x1d   :  { %p611_p0 = por %p610_p13, %p609_p12 }
  0x1f   :  { %p612_p1 = pnand %p611_p0, %p605_p11 }
  0x21   :  { %615 = shalt.err (!%p612_p1)
}
  0x22   :  { %33 = dma.hbm_to_vmem [thread:$0]  %s746_s1, 512, %s28_s24, [#allocation6], %s645_s19, %s645_s19, %s646_s20  }
  0x23   :  { %638 = dma.done.wait [#allocation3], 512  }
  0x24   :  { %639 = vsyncadd [#allocation3], 4294966784 }
  0x25   :  { %640 = dma.done.wait [#allocation6], 512  }
  0x26   :  { %641 = vsyncadd [#allocation6], 4294966784  ;;  %vm48_vm0 = vcmask 261120   ;;  %v44_v0 = vld [vmem:[#allocation5] sm:$0xff]  ;;  %v45_v1 = vld [vmem:[#allocation5 + $0x8] sm:$0xff]  ;;  %s648_s1 = smov 32  }
  0x27   :  { %v46_v2 = vld [vmem:[#allocation5 + $0x10] sm:$0xff]  ;;  %v531_v3 = vpack.c.bf16 %v45_v1, %v44_v0  ;;  %v47_v4 = vld [vmem:[#allocation5 + $0x18] sm:$0xff]  ;;  %v40_v5 = vld [vmem:[#allocation2] sm:$0xff]  ;;  %s649_s6 = smov 96   ;;  %vm416_vm1 = vcmask 523264   ;;  %s650_s7 = smov [#allocation7]  }
  0x28   :  { %v535_v6 = vpack.c.bf16 %v47_v4, %v46_v2  ;;  %491 = vmatprep.mubr.msk.f32.mxu0 %vm48_vm0, %v40_v5  ;;  %v41_v7 = vld [vmem:[#allocation2 + $0x8] sm:$0xff]  ;;  %v42_v8 = vld [vmem:[#allocation2 + $0x10] sm:$0xff]  ;;  %v43_v9 = vld [vmem:[#allocation2 + $0x18] sm:$0xff]  ;;  %s426_s8 = sshll.u32 %s650_s7, 4  ;;  %s427_s8 = int_to_ptr.vmem [resolvable:$true] %s426_s8 }
  0x29   :  { %532 = vmatprep.subr.bf16.mxu0 %v531_v3  ;;  %s616_s9 = scalar_lea.vmem %s427_s8, 512  ;;  %p621_p3 = scmp.lt.s32.totalorder %s427_s8, %s427_s8 }
  0x2a   :  { %534 = vmatpush3.bf16.msra.mxu0 %v531_v3  ;;  %p617_p2 = scmp.ne.s32.totalorder %s427_s8, %s616_s9  ;;  %p622_p4 = scmp.lt.s32.totalorder %s616_s9, %s616_s9 }
  0x2b   :  { %536 = vmatprep.subr.bf16.mxu0 %v535_v6 }
  0x2c   :  { %p623_p5 = por %p622_p4, %p621_p3 }
  0x2e   :  { %538 = vmatpush3.bf16.msra.mxu0 %v535_v6  ;;  %p624_p6 = pnand %p623_p5, %p617_p2 }
  0x31   :  { %492 = vmatmul.mubr.msk.f32.vlgmr.msra.gmra.mrb[0].mxu0 %vm48_vm0, %v41_v7 }
  0x32   :  { %494 = vmatprep.mubr.msk.f32.mxu0 %vm48_vm0, %v42_v8 }
  0x35   :  { %495 = vmatmul.mubr.msk.f32.gmra.mrb[2].mxu0 %vm48_vm0, %v43_v9 }
  0x36   :  { %497 = vmatprep.mubr.msk.f32.mxu0 %vm48_vm0, %v44_v0 }
  0x39   :  { %498 = vmatmul.mubr.msk.f32.gmra.mrb[4].mxu0 %vm48_vm0, %v45_v1 }
  0x3a   :  { %500 = vmatprep.mubr.msk.f32.mxu0 %vm48_vm0, %v46_v2 }
  0x3d   :  { %501 = vmatmul.mubr.msk.f32.gmra.mrb[6].mxu0 %vm48_vm0, %v47_v4 }
 0x104   :  { %v493_v10 = vpop.f32.mrb[0].mxu0 }
 0x105   :  { %v139_v11 = vpop.f32.mrb[1].mxu0 }
 0x106   :  { %511 = vmatprep.mubr.msk.f32.mxu1 %vm48_vm0, %v139_v11 }
 0x108   :  { %v496_v12 = vpop.f32.mrb[2].mxu0 }
 0x109   :  { %v149_v13 = vpop.f32.mrb[3].mxu0 }
 0x10c   :  { %v499_v14 = vpop.f32.mrb[4].mxu0 }
 0x10d   :  { %v159_v15 = vpop.f32.mrb[5].mxu0 }
 0x10e   :  { %v547_v16 = vpack.c.bf16 %v499_v14, %v159_v15  ;;  %v562_v17 = vpack.i.bf16 %v499_v14, %v159_v15 }
 0x110   :  { %563 = vrot.lane.b32.xlu0 %v562_v17, %s648_s1  ;;  %v502_v18 = vpop.f32.mrb[6].mxu0 }
 0x111   :  { %v169_v19 = vpop.f32.mrb[7].mxu0 }
 0x112   :  { %v567_v20 = vpack.i.bf16 %v502_v18, %v169_v19  ;;  %v551_v21 = vpack.c.bf16 %v502_v18, %v169_v19 }
 0x114   :  { %568 = vrot.lane.b32.xlu0 %v567_v20, %s648_s1 }
 0x182   :  { %v564_v22 = vpop.permute.xlu0 %563 }
 0x183   :  { %v566_v23 = vunpack.i.h.bf16 %v564_v22  ;;  %v565_v24 = vunpack.i.l.bf16 %v564_v22 }
 0x185   :  { %v194_v25 = vsel %vm48_vm0, %v139_v11, %v565_v24  ;;  %v195_v26 = vsel %vm48_vm0, %v493_v10, %v566_v23 }
 0x186   :  { %v569_v27 = vpop.permute.xlu0 %568  ;;  %v539_v28 = vpack.c.bf16 %v195_v26, %v194_v25 }
 0x187   :  { %v571_v29 = vunpack.i.h.bf16 %v569_v27  ;;  %v570_v30 = vunpack.i.l.bf16 %v569_v27 }
 0x188   :  { %540 = vmatprep.subr.bf16.mxu1 %v539_v28 }
 0x189   :  { %542 = vmatpush3.bf16.msra.mxu1 %v539_v28  ;;  %v196_v31 = vsel %vm48_vm0, %v149_v13, %v570_v30  ;;  %v197_v32 = vsel %vm48_vm0, %v496_v12, %v571_v29 }
 0x18a   :  { %v543_v33 = vpack.c.bf16 %v197_v32, %v196_v31 }
 0x18c   :  { %544 = vmatprep.subr.bf16.mxu1 %v543_v33 }
 0x18d   :  { %546 = vmatpush3.bf16.msra.mxu1 %v543_v33 }
 0x18e   :  { %548 = vmatprep.subr.bf16.mxu1 %v547_v16 }
 0x190   :  { %512 = vmatmul.mubr.msk.f32.vlgmr.msra.gmra.mrb[0].mxu1 %vm48_vm0, %v493_v10 }
 0x191   :  { %514 = vmatprep.mubr.msk.f32.mxu1 %vm48_vm0, %v149_v13  ;;  %550 = vmatpush3.bf16.msra.mxu1 %v547_v16 }
 0x192   :  { %552 = vmatprep.subr.bf16.mxu1 %v551_v21 }
 0x194   :  { %515 = vmatmul.mubr.msk.f32.gmra.mrb[2].mxu1 %vm48_vm0, %v496_v12 }
 0x195   :  { %554 = vmatpush3.bf16.msra.mxu1 %v551_v21 }
 0x263   :  { %v513_v34 = vpop.f32.mrb[0].mxu1 }
 0x264   :  { %v276_v35 = vpop.f32.mrb[1].mxu1 }
 0x265   :  { %299 = vrot.lane.b32.xlu1 %v276_v35, %s649_s6 }
 0x267   :  { %v516_v36 = vpop.f32.mrb[2].mxu1 }
 0x268   :  { %v286_v37 = vpop.f32.mrb[3].mxu1 }
 0x269   :  { %301 = vrot.lane.b32.xlu1 %v513_v34, %s649_s6  ;;  %303 = vrot.lane.b32.xlu0 %v286_v37, %s649_s6 }
 0x26d   :  { %305 = vrot.lane.b32.xlu1 %v516_v36, %s649_s6  ;;  %400 = vrot.lane.b32.xlu0 %v276_v35, %s648_s1 }
 0x271   :  { %402 = vrot.lane.b32.xlu1 %v513_v34, %s648_s1  ;;  %404 = vrot.lane.b32.xlu0 %v286_v37, %s648_s1 }
 0x275   :  { %406 = vrot.lane.b32.xlu1 %v516_v36, %s648_s1 }
 0x2d7   :  { %v300_v38 = vpop.permute.xlu1 %299 }
 0x2d8   :  { %525 = vmatprep.mubr.msk.f32.mxu1 %vm48_vm0, %v300_v38 }
 0x2db   :  { %v302_v39 = vpop.permute.xlu1 %301  ;;  %v304_v40 = vpop.permute.xlu0 %303 }
 0x2dc   :  { %526 = vmatmul.mubr.msk.f32.vlgmr.msra.gmra.mrb[4].mxu1 %vm48_vm0, %v302_v39 }
 0x2dd   :  { %528 = vmatprep.mubr.msk.f32.mxu1 %vm48_vm0, %v304_v40 }
 0x2df   :  { %v306_v41 = vpop.permute.xlu1 %305  ;;  %v401_v43 = vpop.permute.xlu0 %400 }
 0x2e0   :  { %529 = vmatmul.mubr.msk.f32.gmra.mrb[6].mxu1 %vm48_vm0, %v306_v41 }
 0x2e3   :  { %v403_v42 = vpop.permute.xlu1 %402  ;;  %v405_v50 = vpop.permute.xlu0 %404 }
 0x2e7   :  { %v407_v48 = vpop.permute.xlu1 %406 }
 0x3af   :  { %v527_v44 = vpop.f32.mrb[4].mxu1 }
 0x3b0   :  { %v413_v45 = vsel %vm48_vm0, %v527_v44, %v403_v42  ;;  %v381_v46 = vpop.f32.mrb[5].mxu1 }
 0x3b1   :  { %418 = vst.msk [vmem:[#allocation7 + $0x8] sm:$0xff] %vm416_vm1, %v413_v45  ;;  %v412_v47 = vsel %vm48_vm0, %v381_v46, %v401_v43 }
 0x3b2   :  { %417 = vst.msk [vmem:[#allocation7] sm:$0xff] %vm416_vm1, %v412_v47 }
 0x3b3   :  { %v530_v49 = vpop.f32.mrb[6].mxu1 }
 0x3b4   :  { %v415_v51 = vsel %vm48_vm0, %v530_v49, %v407_v48  ;;  %v391_v52 = vpop.f32.mrb[7].mxu1 }
 0x3b5   :  { %420 = vst.msk [vmem:[#allocation7 + $0x18] sm:$0xff] %vm416_vm1, %v415_v51  ;;  %v414_v53 = vsel %vm48_vm0, %v391_v52, %v405_v50 }
 0x3b6   :  { %419 = vst.msk [vmem:[#allocation7 + $0x10] sm:$0xff] %vm416_vm1, %v414_v53 }
 0x3b7   :  { %627 = shalt.err (!%p624_p6)
}
 0x3b8   :  { %s628_s12 = scalar_lea.hbm %s747_s2, 512 }
 0x3b9   :  { %p629_p7 = scmp.ne.s32.totalorder %s747_s2, %s628_s12  ;;  %p632_p8 = scmp.lt.u32.totalorder %s628_s12, %s747_s2 }
 0x3bb   :  { %p634_p9 = pnand %p632_p8, %p629_p7 }
 0x3bd   :  { %637 = shalt.err (!%p634_p9)
}
 0x3be   :  { %432 = dma.vmem_to_hbm [thread:$0]  %s427_s8, 512, %s747_s2, [#allocation4], %s645_s19, %s645_s19, %s646_s20  }
 0x3bf   :  { %642 = dma.done.wait [#allocation4], 512  }
 0x3c0   :  { %643 = vsyncadd [#allocation4], 4294966784 }
 0x3c1   :  { %436 = vsyncpa [#allocation3], 1 }
 0x3c2   :  { %437 = vsyncpa [#allocation6], 1 }
 0x3c3   :  { %438 = vsyncpa [#allocation4], 1 }

</bundles_post_ra>
